<compile_context>
chip_gen: v6e
topology: v6e:2x2x1
jax: 0.10.0
libtpu: 0.0.40
codegen_flags: <defaults>
</compile_context>

<pallas_src>
import inspect

import jax
import jax.numpy as jnp
from jax.experimental import pallas as pl
from jax.experimental.pallas import tpu as pltpu


# ---------------------------------------------------------------------------
# Kernels
# ---------------------------------------------------------------------------
def mlp_kernel_fused(x_ref, w1_ref, b1_ref, w2_ref, b2_ref, o_ref):
    """One row tile, single K step:  y = relu(x @ W1 + b1) @ W2 + b2.

    Inputs are f32; bf16 casts happen here (hidden under the MXU) with f32
    accumulation via preferred_element_type.
    """
    h = jnp.dot(x_ref[...].astype(jnp.bfloat16),
                w1_ref[...].astype(jnp.bfloat16),
                preferred_element_type=jnp.float32)
    h = jnp.maximum(h + b1_ref[...], 0.0)
    y = jnp.dot(h.astype(jnp.bfloat16),
                w2_ref[...].astype(jnp.bfloat16),
                preferred_element_type=jnp.float32)
    o_ref[...] = (y + b2_ref[...]).astype(o_ref.dtype)


def mlp_kernel_ktiled(x_ref, w1_ref, b1_ref, w2_ref, b2_ref, o_ref, h_acc_ref):
    """K-tiled fc1 with f32 VMEM accumulator; fc2 epilogue on the last K step."""
    k = pl.program_id(1)

    @pl.when(k == 0)
    def _():
        h_acc_ref[...] = jnp.zeros_like(h_acc_ref)

    h_acc_ref[...] += jnp.dot(
        x_ref[...].astype(jnp.bfloat16), w1_ref[...].astype(jnp.bfloat16),
        preferred_element_type=jnp.float32)

    @pl.when(k == pl.num_programs(1) - 1)
    def _():
        h = jnp.maximum(h_acc_ref[...] + b1_ref[...], 0.0)
        y = jnp.dot(h.astype(jnp.bfloat16), w2_ref[...].astype(jnp.bfloat16),
                    preferred_element_type=jnp.float32)
        o_ref[...] = (y + b2_ref[...]).astype(o_ref.dtype)


# ---------------------------------------------------------------------------
# Helpers
# ---------------------------------------------------------------------------
def _round_up(n, m):
    return ((n + m - 1) // m) * m


def _supports_pipeline_mode():
    """Explicit capability check for pl.BlockSpec(..., pipeline_mode=...)."""
    if not hasattr(pl, "Buffered"):
        return False
    try:
        return "pipeline_mode" in inspect.signature(pl.BlockSpec).parameters
    except (TypeError, ValueError):
        return False


def _num_tensorcores_per_chip():
    try:
        kind = jax.devices()[0].device_kind.lower()
    except Exception:
        return 1
    return 2 if ("v7" in kind or "7x" in kind) else 1


def _vmem_budget_bytes():
    cap = 0
    try:
        info = pltpu.get_tpu_info()
        cap = int(getattr(info, "vmem_capacity_bytes", 0) or 0)
    except Exception:
        cap = 0
    if cap <= 0:
        cap = 64 * 2 ** 20  # conservative default: v7x per-TensorCore VMEM
    return int(cap * 0.85)   # ~15% headroom


def _select_tm(B, requested_tm=None):
    b16 = _round_up(max(B, 1), 16)
    if requested_tm is not None:
        tm = _round_up(max(16, requested_tm), 16)
    elif _num_tensorcores_per_chip() >= 2:
        # v7x: keep >=2 "parallel" row tiles so both TensorCores get work.
        tm = 256 if b16 >= 512 else 128
    else:
        # v5e/v6e: single TC -> one big row tile (fills v6e's 256-wide MXU,
        # fewer grid steps / less per-step overhead).
        tm = 256
    tm = min(tm, b16)
    return max(16, _round_up(tm, 16))


def _select_tk(in_dim, requested_tk):
    """Largest multiple of 128 <= requested_tk that divides in_dim (else full)."""
    tk = min(requested_tk, in_dim)
    tk = (tk // 128) * 128
    while tk > 128 and in_dim % tk != 0:
        tk -= 128
    if tk < 128 or in_dim % tk != 0:
        tk = in_dim
    return tk


# ---------------------------------------------------------------------------
# pallas_call builder
# ---------------------------------------------------------------------------
def _build_call(B_pad, in_dim, out_p, tm, tk, out_dtype,
                single_buffer_resident, vmem_budget):
    resident = pl.Buffered(1) if single_buffer_resident else None

    def spec(shape, index_map, mode=None):
        if mode is None:
            return pl.BlockSpec(shape, index_map)
        return pl.BlockSpec(shape, index_map, pipeline_mode=mode)

    wc = 1 if single_buffer_resident else 2
    n_m = B_pad // tm
    single_k = tk >= in_dim

    if single_k:
        # Fully fused: one grid step per row tile, everything resident, no
        # accumulator scratch and no pl.when bookkeeping.
        grid = (n_m,)
        in_specs = [
            pl.BlockSpec((tm, in_dim), lambda i: (i, 0)),            # x rows
            spec((in_dim, in_dim), lambda i: (0, 0), resident),      # W1
            spec((1, in_dim), lambda i: (0, 0), resident),           # b1
            spec((in_dim, out_p), lambda i: (0, 0), resident),       # W2
            spec((1, out_p), lambda i: (0, 0), resident),            # b2
        ]
        out_spec = pl.BlockSpec((tm, out_p), lambda i: (i, 0))
        scratch = []
        kernel = mlp_kernel_fused
        dims = ("parallel",)
        est = (2 * tm * in_dim * 4
               + wc * (in_dim * in_dim + in_dim * out_p + in_dim + out_p) * 4
               + 2 * tm * out_p * 4)
    else:
        # K-tiled fc1; W2/biases resident, fc2 epilogue on last K step.
        # TODO(synk): for very large in_dim*out_dim on v7x (64 MiB VMEM), tile
        # the hidden dim of W2 instead of keeping it fully resident.
        n_k = in_dim // tk
        grid = (n_m, n_k)
        in_specs = [
            pl.BlockSpec((tm, tk), lambda i, k: (i, k)),             # x tile
            pl.BlockSpec((tk, in_dim), lambda i, k: (k, 0)),         # W1 slab
            spec((1, in_dim), lambda i, k: (0, 0), resident),        # b1
            spec((in_dim, out_p), lambda i, k: (0, 0), resident),    # W2
            spec((1, out_p), lambda i, k: (0, 0), resident),         # b2
        ]
        out_spec = pl.BlockSpec((tm, out_p), lambda i, k: (i, 0))
        scratch = [pltpu.VMEM((tm, in_dim), jnp.float32)]
        kernel = mlp_kernel_ktiled
        dims = ("parallel", "arbitrary")
        est = (2 * (tm * tk * 4 + tk * in_dim * 4)
               + wc * (in_dim * out_p + in_dim + out_p) * 4
               + 2 * tm * out_p * 4
               + tm * in_dim * 4)

    vmem_limit = int(min(vmem_budget, max(2 * est, 16 * 2 ** 20)))
    flops = 2 * B_pad * in_dim * (in_dim + out_p)
    bytes_accessed = (B_pad * in_dim * 4 + in_dim * in_dim * 4
                      + in_dim * out_p * 4 + (in_dim + out_p) * 4
                      + B_pad * out_p * jnp.dtype(out_dtype).itemsize)

    return pl.pallas_call(
        kernel,
        out_shape=jax.ShapeDtypeStruct((B_pad, out_p), out_dtype),
        grid_spec=pltpu.PrefetchScalarGridSpec(
            num_scalar_prefetch=0,
            grid=grid,
            in_specs=in_specs,
            out_specs=out_spec,
            scratch_shapes=scratch,
        ),
        compiler_params=pltpu.CompilerParams(
            dimension_semantics=dims,
            vmem_limit_bytes=vmem_limit,
        ),
        cost_estimate=pl.CostEstimate(
            flops=flops, transcendentals=0, bytes_accessed=bytes_accessed),
    )


# ---------------------------------------------------------------------------
# Public wrapper
# ---------------------------------------------------------------------------
def testnet_forward(x, w1, b1, w2, b2, *, tm=None, tk=512):
    """Fused fc1 -> ReLU -> fc2 (bf16 on the MXU, f32 accumulation).

    x  : (B, in_dim)
    w1 : (in_dim, in_dim)   b1 : (in_dim,)
    w2 : (in_dim, out_dim)  b2 : (out_dim,)
    returns (B, out_dim) in x.dtype
    """
    B, in_dim = x.shape
    out_dim = w2.shape[1]
    out_dtype = x.dtype

    tm = _select_tm(B, tm)
    B_pad = _round_up(B, tm)
    out_p = _round_up(out_dim, 128)   # lane-dense stores

    vmem_budget = _vmem_budget_bytes()
    single_buffer = _supports_pipeline_mode()
    wc = 1 if single_buffer else 2

    # Fused single-K path when all resident operands + streamed tiles fit VMEM
    # (always true for the test shapes); otherwise K-tile fc1.
    bytes_resident = wc * (in_dim * in_dim + in_dim * out_p
                           + in_dim + out_p) * 4
    bytes_streamed = 2 * tm * in_dim * 4 + 2 * tm * out_p * 4
    fused_fits = (bytes_resident + bytes_streamed) * 1.25 < vmem_budget

    if fused_fits or in_dim % 128 != 0:
        tk_eff = in_dim
    else:
        tk_eff = _select_tk(in_dim, tk)

    # Pad only when actually required (no-op / no HBM copy for aligned shapes).
    xp = x if B_pad == B else jnp.pad(x, ((0, B_pad - B), (0, 0)))
    w2p = w2 if out_p == out_dim else jnp.pad(w2, ((0, 0), (0, out_p - out_dim)))
    b2p = b2 if out_p == out_dim else jnp.pad(b2, (0, out_p - out_dim))
    b1_2d = b1.reshape(1, in_dim)
    b2_2d = b2p.reshape(1, out_p)

    def run(use_single_buffer):
        call = _build_call(B_pad, in_dim, out_p, tm, tk_eff, out_dtype,
                           single_buffer_resident=use_single_buffer,
                           vmem_budget=vmem_budget)
        return call(xp, w1, b1_2d, w2p, b2_2d)

    if single_buffer:
        # Narrow, explicit fallback only for "pipeline_mode / Buffered(1) not
        # supported here" style failures -- never a blanket `except Exception`.
        try:
            out = run(True)
        except (TypeError, ValueError, NotImplementedError,
                pltpu.LoweringException):
            out = run(False)
    else:
        out = run(False)

    return out[:B, :out_dim]


def init_params(key, in_dim, out_dim, dtype=jnp.float32):
    """Deterministic synthetic parameters (transposed nn.Linear layout)."""
    k1, k2, k3, k4 = jax.random.split(key, 4)
    s1 = 1.0 / (in_dim ** 0.5)
    w1 = jax.random.uniform(k1, (in_dim, in_dim), dtype, -s1, s1)
    b1 = jax.random.uniform(k2, (in_dim,), dtype, -s1, s1)
    w2 = jax.random.uniform(k3, (in_dim, out_dim), dtype, -s1, s1)
    b2 = jax.random.uniform(k4, (out_dim,), dtype, -s1, s1)
    return w1, b1, w2, b2


if __name__ == "__main__":
    # Small shapes consistent with TestNet (Linear -> ReLU -> Linear).
    B, in_dim, out_dim = 256, 256, 128

    key = jax.random.PRNGKey(0)
    kx, kp = jax.random.split(key)
    x = jax.random.normal(kx, (B, in_dim), jnp.float32)
    w1, b1, w2, b2 = init_params(kp, in_dim, out_dim)

    out = testnet_forward(x, w1, b1, w2, b2)
    out = jax.block_until_ready(out)
    assert out.shape == (B, out_dim)

    # Reference matching the kernel numerics (bf16 MXU inputs, f32 accum).
    h_ref = jnp.maximum(
        jnp.dot(x.astype(jnp.bfloat16), w1.astype(jnp.bfloat16),
                preferred_element_type=jnp.float32) + b1, 0.0)
    ref = jnp.dot(h_ref.astype(jnp.bfloat16), w2.astype(jnp.bfloat16),
                  preferred_element_type=jnp.float32) + b2
    assert jnp.allclose(out, ref, atol=2e-2, rtol=2e-2), (
        float(jnp.max(jnp.abs(out - ref))))

    # Looser semantic check against pure-f32 math (deliberate bf16 trade-off).
    ref_f32 = jnp.maximum(x @ w1 + b1, 0.0) @ w2 + b2
    assert jnp.allclose(out, ref_f32, atol=5e-1, rtol=5e-2)

    print("KERNEL_OK")
</pallas_src>

<mosaic_0001>
module attributes {stable_mosaic.version = 11 : i64} {
  func.func @mlp_kernel_fused(%arg0: i32, %arg1: memref<256x256xf32, #tpu.memory_space<vmem>>, %arg2: memref<256x256xf32, #tpu.memory_space<vmem>>, %arg3: memref<1x256xf32, #tpu.memory_space<vmem>>, %arg4: memref<256x128xf32, #tpu.memory_space<vmem>>, %arg5: memref<1x128xf32, #tpu.memory_space<vmem>>, %arg6: memref<256x128xf32, #tpu.memory_space<vmem>>) attributes {dimension_semantics = [#tpu.dimension_semantics<parallel>], iteration_bounds = array<i64: 1>, scalar_prefetch = 0 : i64, scratch_operands = 0 : i64, tpu.core_type = #tpu.core_type<tc>, window_params = [{transform_indices = @transform_0, window_bounds = array<i64: 256, 256>}, {pipeline_mode = #tpu.pipeline_mode<synchronous>, transform_indices = @transform_1, window_bounds = array<i64: 256, 256>}, {pipeline_mode = #tpu.pipeline_mode<synchronous>, transform_indices = @transform_2, window_bounds = array<i64: 1, 256>}, {pipeline_mode = #tpu.pipeline_mode<synchronous>, transform_indices = @transform_3, window_bounds = array<i64: 256, 128>}, {pipeline_mode = #tpu.pipeline_mode<synchronous>, transform_indices = @transform_4, window_bounds = array<i64: 1, 128>}, {transform_indices = @transform_5, window_bounds = array<i64: 256, 128>}]} {
    %c0 = arith.constant 0 : index
    %c0_0 = arith.constant 0 : index
    %0 = vector.load %arg1[%c0, %c0_0] : memref<256x256xf32, #tpu.memory_space<vmem>>, vector<256x256xf32>
    %1 = arith.truncf %0 : vector<256x256xf32> to vector<256x256xbf16>
    %c0_1 = arith.constant 0 : index
    %c0_2 = arith.constant 0 : index
    %2 = vector.load %arg2[%c0_1, %c0_2] : memref<256x256xf32, #tpu.memory_space<vmem>>, vector<256x256xf32>
    %3 = arith.truncf %2 : vector<256x256xf32> to vector<256x256xbf16>
    %cst = arith.constant dense<0.000000e+00> : vector<256x256xf32>
    %4 = tpu.matmul %1, %3, %cst {dimension_numbers = #tpu.dot_dimension_numbers<[1], [0], [0], [1], [0, 0, 1, 1], [], []>} : vector<256x256xbf16>, vector<256x256xbf16>, vector<256x256xf32> -> vector<256x256xf32>
    %c0_3 = arith.constant 0 : index
    %c0_4 = arith.constant 0 : index
    %5 = vector.load %arg3[%c0_3, %c0_4] : memref<1x256xf32, #tpu.memory_space<vmem>>, vector<1x256xf32>
    %6 = vector.broadcast %5 : vector<1x256xf32> to vector<256x256xf32>
    %7 = arith.addf %4, %6 : vector<256x256xf32>
    %cst_5 = arith.constant 0.000000e+00 : f32
    %8 = vector.broadcast %cst_5 : f32 to vector<256x256xf32>
    %9 = arith.maximumf %7, %8 : vector<256x256xf32>
    %10 = arith.truncf %9 : vector<256x256xf32> to vector<256x256xbf16>
    %c0_6 = arith.constant 0 : index
    %c0_7 = arith.constant 0 : index
    %11 = vector.load %arg4[%c0_6, %c0_7] : memref<256x128xf32, #tpu.memory_space<vmem>>, vector<256x128xf32>
    %12 = arith.truncf %11 : vector<256x128xf32> to vector<256x128xbf16>
    %cst_8 = arith.constant dense<0.000000e+00> : vector<256x128xf32>
    %13 = tpu.matmul %10, %12, %cst_8 {dimension_numbers = #tpu.dot_dimension_numbers<[1], [0], [0], [1], [0, 0, 1, 1], [], []>} : vector<256x256xbf16>, vector<256x128xbf16>, vector<256x128xf32> -> vector<256x128xf32>
    %c0_9 = arith.constant 0 : index
    %c0_10 = arith.constant 0 : index
    %14 = vector.load %arg5[%c0_9, %c0_10] : memref<1x128xf32, #tpu.memory_space<vmem>>, vector<1x128xf32>
    %15 = vector.broadcast %14 : vector<1x128xf32> to vector<256x128xf32>
    %16 = arith.addf %13, %15 : vector<256x128xf32>
    %c0_11 = arith.constant 0 : index
    %c0_12 = arith.constant 0 : index
    %17 = vector.load %arg6[%c0_11, %c0_12] : memref<256x128xf32, #tpu.memory_space<vmem>>, vector<256x128xf32>
    tpu.vector_store %arg6[%c0_11, %c0_12], %16 {strides = array<i32>} : memref<256x128xf32, #tpu.memory_space<vmem>>, vector<256x128xf32>,
    return
  }
  func.func @transform_0(%arg0: i32) -> (i32, i32) {
    %c0_i32 = arith.constant 0 : i32
    %c0_i32_0 = arith.constant 0 : i32
    return %arg0, %c0_i32 : i32, i32
  }
  func.func @transform_1(%arg0: i32) -> (i32, i32) {
    %c0_i32 = arith.constant 0 : i32
    %c0_i32_0 = arith.constant 0 : i32
    %c0_i32_1 = arith.constant 0 : i32
    return %c0_i32, %c0_i32_0 : i32, i32
  }
  func.func @transform_2(%arg0: i32) -> (i32, i32) {
    %c0_i32 = arith.constant 0 : i32
    %c0_i32_0 = arith.constant 0 : i32
    %c0_i32_1 = arith.constant 0 : i32
    return %c0_i32, %c0_i32_0 : i32, i32
  }
  func.func @transform_3(%arg0: i32) -> (i32, i32) {
    %c0_i32 = arith.constant 0 : i32
    %c0_i32_0 = arith.constant 0 : i32
    %c0_i32_1 = arith.constant 0 : i32
    return %c0_i32, %c0_i32_0 : i32, i32
  }
  func.func @transform_4(%arg0: i32) -> (i32, i32) {
    %c0_i32 = arith.constant 0 : i32
    %c0_i32_0 = arith.constant 0 : i32
    %c0_i32_1 = arith.constant 0 : i32
    return %c0_i32, %c0_i32_0 : i32, i32
  }
  func.func @transform_5(%arg0: i32) -> (i32, i32) {
    %c0_i32 = arith.constant 0 : i32
    %c0_i32_0 = arith.constant 0 : i32
    return %arg0, %c0_i32 : i32, i32
  }
}

</mosaic_0001>

<bundles_post_ra>
// kernel: tpu_custom_call.1
= control target key start
LH: loop header
LB: loop body
LE: loop exit
PB: predicated region body
PF: predicated region fallthrough
CT: control target
= control target key end

     0   :  { %10 = vsyncpa [#allocation3], 0  ;;  %s1193_s0 = inlined_call_operand.hbm [shape: f32[256,256], index: 0, kind: input, shape index: {}]   ;;  %s1194_s1 = inlined_call_operand.hbm [shape: f32[256,256], index: 1, kind: input, shape index: {}]   ;;  %s1195_s2 = inlined_call_operand.vmem [shape: f32[1,256], index: 2, kind: input, shape index: {}]   ;;  %s1196_s3 = inlined_call_operand.hbm [shape: f32[256,128], index: 3, kind: input, shape index: {}]   ;;  %s1197_s4 = inlined_call_operand.vmem [shape: f32[1,128], index: 4, kind: input, shape index: {}]   ;;  %s1198_s5 = inlined_call_operand.hbm [shape: f32[256,128], index: 5, kind: output, shape index: {}]  }
   0x1   :  { %11 = vsyncpa [#allocation6], 0 }
   0x2   :  { %12 = vsyncpa [#allocation4], 0  ;;  %s1029_s18 = smov [#allocation5]   ;;  %s1030_s20 = smov [#allocation2]  }
   0x3   :  { %s30_s19 = sshll.u32 %s1029_s18, 4  ;;  %s18_s21 = sshll.u32 %s1030_s20, 4  ;;  %s31_s19 = int_to_ptr.vmem [resolvable:$true] %s30_s19  ;;  %s19_s21 = int_to_ptr.vmem [resolvable:$true] %s18_s21 }
   0x4   :  { %s951_s22 = scalar_lea.vmem %s31_s19, 8192  ;;  %p956_p1 = scmp.lt.s32.totalorder %s31_s19, %s31_s19 }
   0x5   :  { %p952_p0 = scmp.ne.s32.totalorder %s31_s19, %s951_s22  ;;  %p957_p2 = scmp.lt.s32.totalorder %s951_s22, %s951_s22 }
   0x7   :  { %p958_p3 = por %p957_p2, %p956_p1 }
   0x9   :  { %p959_p4 = pnand %p958_p3, %p952_p0 }
   0xb   :  { %962 = shalt.err (!%p959_p4)
}
   0xc   :  { %s1031_s23 = smov 256   ;;  %s1032_s24 = smov 16  }
   0xd   :  { %36 = dma.hbm_to_vmem [thread:$0]  %s1194_s1, 8192, %s31_s19, [#allocation6], %s1031_s23, %s1031_s23, %s1032_s24  }
   0xe   :  { %s971_s27 = scalar_lea.vmem %s19_s21, 8192  ;;  %p976_p6 = scmp.lt.s32.totalorder %s19_s21, %s19_s21 }
   0xf   :  { %p972_p5 = scmp.ne.s32.totalorder %s19_s21, %s971_s27  ;;  %p977_p7 = scmp.lt.s32.totalorder %s971_s27, %s971_s27 }
  0x11   :  { %p978_p8 = por %p977_p7, %p976_p6 }
  0x13   :  { %p979_p9 = pnand %p978_p8, %p972_p5 }
  0x15   :  { %982 = shalt.err (!%p979_p9)
}
  0x16   :  { %24 = dma.hbm_to_vmem [thread:$0]  %s1193_s0, 8192, %s19_s21, [#allocation3], %s1031_s23, %s1031_s23, %s1032_s24  }
  0x17   :  { %s1033_s30 = smov [#allocation7]  }
  0x18   :  { %s44_s6 = sshll.u32 %s1033_s30, 4  ;;  %s45_s6 = int_to_ptr.vmem [resolvable:$true] %s44_s6 }
  0x19   :  { %s991_s7 = scalar_lea.vmem %s45_s6, 4096  ;;  %p996_p11 = scmp.lt.s32.totalorder %s45_s6, %s45_s6 }
  0x1a   :  { %p992_p10 = scmp.ne.s32.totalorder %s45_s6, %s991_s7  ;;  %p997_p12 = scmp.lt.s32.totalorder %s991_s7, %s991_s7 }
  0x1c   :  { %p998_p13 = por %p997_p12, %p996_p11 }
  0x1e   :  { %p999_p0 = pnand %p998_p13, %p992_p10 }
  0x20   :  { %1002 = shalt.err (!%p999_p0)
}
  0x21   :  { %s1034_s1 = smov 128   ;;  %s1035_s8 = smov 8  }
  0x22   :  { %50 = dma.hbm_to_vmem [thread:$0]  %s1196_s3, 4096, %s45_s6, [#allocation6], %s1034_s1, %s1034_s1, %s1035_s8  }
  0x23   :  { %1023 = dma.done.wait [#allocation3], 8192  }
  0x24   :  { %1024 = vsyncadd [#allocation3], 4294959104 }
  0x25   :  { %1025 = dma.done.wait [#allocation6], 12288  }
  0x26   :  { %1026 = vsyncadd [#allocation6], 4294955008  ;;  %v188_v0 = vld [vmem:[#allocation5 + $0xe8] sm:$0xff]  ;;  %v190_v1 = vld [vmem:[#allocation5 + $0xf8] sm:$0xff] }
  0x27   :  { %v187_v2 = vld [vmem:[#allocation5 + $0xe0] sm:$0xff]  ;;  %v238_v3 = vpack.c.bf16 %v190_v1, %v188_v0  ;;  %v189_v4 = vld [vmem:[#allocation5 + $0xf0] sm:$0xff]  ;;  %v184_v5 = vld [vmem:[#allocation5 + $0xc8] sm:$0xff] }
  0x28   :  { %v186_v6 = vld [vmem:[#allocation5 + $0xd8] sm:$0xff]  ;;  %v237_v7 = vpack.c.bf16 %v189_v4, %v187_v2  ;;  %v183_v9 = vld [vmem:[#allocation5 + $0xc0] sm:$0xff]  ;;  %v185_v10 = vld [vmem:[#allocation5 + $0xd0] sm:$0xff] }
  0x29   :  { %v236_v8 = vpack.c.bf16 %v186_v6, %v184_v5  ;;  %v180_v11 = vld [vmem:[#allocation5 + $0xa8] sm:$0xff]  ;;  %267 = vmatprep.subr.bf16.mxu0 %v238_v3  ;;  %v182_v12 = vld [vmem:[#allocation5 + $0xb8] sm:$0xff]  ;;  %v235_v13 = vpack.c.bf16 %v185_v10, %v183_v9  ;;  %v179_v15 = vld [vmem:[#allocation5 + $0xa0] sm:$0xff] }
  0x2a   :  { %268 = vmatpush1.bf16.msra.mxu0 %v237_v7  ;;  %v234_v14 = vpack.c.bf16 %v182_v12, %v180_v11  ;;  %v181_v16 = vld [vmem:[#allocation5 + $0xb0] sm:$0xff]  ;;  %v176_v17 = vld [vmem:[#allocation5 + $0x88] sm:$0xff]  ;;  %v178_v18 = vld [vmem:[#allocation5 + $0x98] sm:$0xff] }
  0x2b   :  { %269 = vmatprep.subr.bf16.mxu0 %v236_v8  ;;  %v233_v19 = vpack.c.bf16 %v181_v16, %v179_v15  ;;  %v232_v20 = vpack.c.bf16 %v178_v18, %v176_v17  ;;  %v175_v21 = vld [vmem:[#allocation5 + $0x80] sm:$0xff]  ;;  %v177_v22 = vld [vmem:[#allocation5 + $0x90] sm:$0xff]  ;;  %v172_v23 = vld [vmem:[#allocation5 + $0x68] sm:$0xff] }
  0x2c   :  { %v174_v24 = vld [vmem:[#allocation5 + $0x78] sm:$0xff]  ;;  %v231_v25 = vpack.c.bf16 %v177_v22, %v175_v21  ;;  %v171_v27 = vld [vmem:[#allocation5 + $0x60] sm:$0xff]  ;;  %v173_v28 = vld [vmem:[#allocation5 + $0x70] sm:$0xff] }
  0x2d   :  { %v230_v26 = vpack.c.bf16 %v174_v24, %v172_v23  ;;  %v168_v29 = vld [vmem:[#allocation5 + $0x48] sm:$0xff]  ;;  %v170_v30 = vld [vmem:[#allocation5 + $0x58] sm:$0xff]  ;;  %v229_v31 = vpack.c.bf16 %v173_v28, %v171_v27  ;;  %v167_v33 = vld [vmem:[#allocation5 + $0x40] sm:$0xff] }
  0x2e   :  { %270 = vmatpush1.bf16.msra.mxu0 %v235_v13  ;;  %v228_v32 = vpack.c.bf16 %v170_v30, %v168_v29  ;;  %v169_v34 = vld [vmem:[#allocation5 + $0x50] sm:$0xff]  ;;  %v164_v35 = vld [vmem:[#allocation5 + $0x28] sm:$0xff]  ;;  %v166_v36 = vld [vmem:[#allocation5 + $0x38] sm:$0xff] }
  0x2f   :  { %271 = vmatprep.subr.bf16.mxu0 %v234_v14  ;;  %v227_v37 = vpack.c.bf16 %v169_v34, %v167_v33  ;;  %v163_v38 = vld [vmem:[#allocation5 + $0x20] sm:$0xff]  ;;  %v226_v39 = vpack.c.bf16 %v166_v36, %v164_v35  ;;  %v165_v40 = vld [vmem:[#allocation5 + $0x30] sm:$0xff]  ;;  %v64_v41 = vld [vmem:[#allocation2 + $0x8] sm:$0xff] }
  0x30   :  { %v66_v42 = vld [vmem:[#allocation2 + $0x18] sm:$0xff]  ;;  %v160_v43 = vld [vmem:[#allocation5 + $0x8] sm:$0xff]  ;;  %v225_v46 = vpack.c.bf16 %v165_v40, %v163_v38  ;;  %v159_v48 = vld [vmem:[#allocation5] sm:$0xff] }
  0x31   :  { %v162_v44 = vld [vmem:[#allocation5 + $0x18] sm:$0xff]  ;;  %v128_v45 = vpack.c.bf16 %v66_v42, %v64_v41  ;;  %v161_v49 = vld [vmem:[#allocation5 + $0x10] sm:$0xff]  ;;  %v220_v50 = vld [vmem:[#allocation5 + $0x1e8] sm:$0xff] }
  0x32   :  { %272 = vmatpush1.bf16.msra.mxu0 %v233_v19  ;;  %v224_v47 = vpack.c.bf16 %v162_v44, %v160_v43  ;;  %v222_v51 = vld [vmem:[#allocation5 + $0x1f8] sm:$0xff]  ;;  %v223_v52 = vpack.c.bf16 %v161_v49, %v159_v48  ;;  %v219_v54 = vld [vmem:[#allocation5 + $0x1e0] sm:$0xff]  ;;  %v221_v55 = vld [vmem:[#allocation5 + $0x1f0] sm:$0xff] }
  0x33   :  { %273 = vmatprep.subr.bf16.mxu0 %v232_v20  ;;  %299 = vmatprep.mubr.bf16.mxu0 %v128_v45  ;;  %v254_v53 = vpack.c.bf16 %v222_v51, %v220_v50  ;;  %v216_v56 = vld [vmem:[#allocation5 + $0x1c8] sm:$0xff]  ;;  %v218_v57 = vld [vmem:[#allocation5 + $0x1d8] sm:$0xff]  ;;  %v253_v58 = vpack.c.bf16 %v221_v55, %v219_v54  ;;  %v215_v60 = vld [vmem:[#allocation5 + $0x1c0] sm:$0xff] }
  0x34   :  { %v252_v59 = vpack.c.bf16 %v218_v57, %v216_v56  ;;  %v217_v61 = vld [vmem:[#allocation5 + $0x1d0] sm:$0xff]  ;;  %v212_v62 = vld [vmem:[#allocation5 + $0x1a8] sm:$0xff]  ;;  %v214_v63 = vld [vmem:[#allocation5 + $0x1b8] sm:$0xff] }
  0x35   :  { %v251_v0 = vpack.c.bf16 %v217_v61, %v215_v60  ;;  %v250_v1 = vpack.c.bf16 %v214_v63, %v212_v62  ;;  %v211_v2 = vld [vmem:[#allocation5 + $0x1a0] sm:$0xff]  ;;  %v213_v3 = vld [vmem:[#allocation5 + $0x1b0] sm:$0xff]  ;;  %v208_v4 = vld [vmem:[#allocation5 + $0x188] sm:$0xff] }
  0x36   :  { %274 = vmatpush1.bf16.msra.mxu0 %v231_v25  ;;  %v210_v5 = vld [vmem:[#allocation5 + $0x198] sm:$0xff]  ;;  %v249_v6 = vpack.c.bf16 %v213_v3, %v211_v2  ;;  %v207_v8 = vld [vmem:[#allocation5 + $0x180] sm:$0xff]  ;;  %v209_v9 = vld [vmem:[#allocation5 + $0x190] sm:$0xff] }
  0x37   :  { %275 = vmatprep.subr.bf16.mxu0 %v230_v26  ;;  %v248_v7 = vpack.c.bf16 %v210_v5, %v208_v4  ;;  %v204_v10 = vld [vmem:[#allocation5 + $0x168] sm:$0xff]  ;;  %v206_v11 = vld [vmem:[#allocation5 + $0x178] sm:$0xff]  ;;  %v247_v12 = vpack.c.bf16 %v209_v9, %v207_v8  ;;  %v203_v14 = vld [vmem:[#allocation5 + $0x160] sm:$0xff] }
  0x38   :  { %v246_v13 = vpack.c.bf16 %v206_v11, %v204_v10  ;;  %v205_v15 = vld [vmem:[#allocation5 + $0x170] sm:$0xff]  ;;  %v200_v16 = vld [vmem:[#allocation5 + $0x148] sm:$0xff]  ;;  %v202_v17 = vld [vmem:[#allocation5 + $0x158] sm:$0xff] }
  0x39   :  { %v245_v18 = vpack.c.bf16 %v205_v15, %v203_v14  ;;  %v244_v19 = vpack.c.bf16 %v202_v17, %v200_v16  ;;  %v199_v20 = vld [vmem:[#allocation5 + $0x140] sm:$0xff]  ;;  %v201_v21 = vld [vmem:[#allocation5 + $0x150] sm:$0xff]  ;;  %v196_v22 = vld [vmem:[#allocation5 + $0x128] sm:$0xff] }
  0x3a   :  { %276 = vmatpush1.bf16.msra.mxu0 %v229_v31  ;;  %v198_v23 = vld [vmem:[#allocation5 + $0x138] sm:$0xff]  ;;  %v243_v24 = vpack.c.bf16 %v201_v21, %v199_v20  ;;  %v195_v26 = vld [vmem:[#allocation5 + $0x120] sm:$0xff]  ;;  %v197_v27 = vld [vmem:[#allocation5 + $0x130] sm:$0xff] }
  0x3b   :  { %277 = vmatprep.subr.bf16.mxu0 %v228_v32  ;;  %v242_v25 = vpack.c.bf16 %v198_v23, %v196_v22  ;;  %v192_v28 = vld [vmem:[#allocation5 + $0x108] sm:$0xff]  ;;  %v194_v29 = vld [vmem:[#allocation5 + $0x118] sm:$0xff]  ;;  %v241_v30 = vpack.c.bf16 %v197_v27, %v195_v26  ;;  %v191_v32 = vld [vmem:[#allocation5 + $0x100] sm:$0xff] }
  0x3c   :  { %v240_v31 = vpack.c.bf16 %v194_v29, %v192_v28  ;;  %v193_v33 = vld [vmem:[#allocation5 + $0x110] sm:$0xff]  ;;  %v63_v34 = vld [vmem:[#allocation2] sm:$0xff]  ;;  %v68_v36 = vld [vmem:[#allocation2 + $0x28] sm:$0xff] }
  0x3d   :  { %v65_v35 = vld [vmem:[#allocation2 + $0x10] sm:$0xff]  ;;  %v239_v41 = vpack.c.bf16 %v193_v33, %v191_v32  ;;  %v571_v43 = vld [vmem:[#allocation7 + $0x78] sm:$0xff]  ;;  %v584_v44 = vld [vmem:[#allocation7 + $0xe0] sm:$0xff] }
  0x3e   :  { %278 = vmatpush1.bf16.msra.mxu0 %v227_v37  ;;  %v70_v37 = vld [vmem:[#allocation2 + $0x38] sm:$0xff]  ;;  %v586_v38 = vld [vmem:[#allocation7 + $0xf0] sm:$0xff]  ;;  %v585_v45 = vld [vmem:[#allocation7 + $0xe8] sm:$0xff] }
  0x3f   :  { %279 = vmatprep.subr.bf16.mxu0 %v226_v39  ;;  %v587_v39 = vld [vmem:[#allocation7 + $0xf8] sm:$0xff]  ;;  %v570_v40 = vld [vmem:[#allocation7 + $0x70] sm:$0xff]  ;;  %v568_v48 = vld [vmem:[#allocation7 + $0x60] sm:$0xff]  ;;  %v130_v54 = vpack.c.bf16 %v70_v37, %v68_v36 }
  0x40   :  { %v603_v42 = vpack.c.bf16 %v587_v39, %v586_v38  ;;  %v569_v49 = vld [vmem:[#allocation7 + $0x68] sm:$0xff]  ;;  %v582_v50 = vld [vmem:[#allocation7 + $0xd0] sm:$0xff]  ;;  %v583_v51 = vld [vmem:[#allocation7 + $0xd8] sm:$0xff] }
  0x41   :  { %v601_v55 = vpack.c.bf16 %v583_v51, %v582_v50  ;;  %v566_v56 = vld [vmem:[#allocation7 + $0x50] sm:$0xff]  ;;  %v567_v57 = vld [vmem:[#allocation7 + $0x58] sm:$0xff]  ;;  %v67_v60 = vld [vmem:[#allocation2 + $0x20] sm:$0xff] }
  0x42   :  { %280 = vmatpush1.bf16.msra.mxu0 %v225_v46  ;;  %v595_v46 = vpack.c.bf16 %v571_v43, %v570_v40  ;;  %823 = vmatprep.subr.bf16.mxu1 %v603_v42  ;;  %v69_v61 = vld [vmem:[#allocation2 + $0x30] sm:$0xff]  ;;  %v593_v62 = vpack.c.bf16 %v567_v57, %v566_v56  ;;  %v72_v63 = vld [vmem:[#allocation2 + $0x48] sm:$0xff]  ;;  %v74_v3 = vld [vmem:[#allocation2 + $0x58] sm:$0xff] }
  0x43   :  { %281 = vmatprep.subr.bf16.mxu0 %v224_v47  ;;  %v602_v47 = vpack.c.bf16 %v585_v45, %v584_v44  ;;  %v565_v2 = vld [vmem:[#allocation7 + $0x48] sm:$0xff]  ;;  %v578_v4 = vld [vmem:[#allocation7 + $0xb0] sm:$0xff]  ;;  %v579_v5 = vld [vmem:[#allocation7 + $0xb8] sm:$0xff]  ;;  %v132_v8 = vpack.c.bf16 %v74_v3, %v72_v63 }
  0x44   :  { %824 = vmatpush3.bf16.msra.mxu1 %v595_v46  ;;  %v599_v9 = vpack.c.bf16 %v579_v5, %v578_v4  ;;  %v562_v10 = vld [vmem:[#allocation7 + $0x30] sm:$0xff]  ;;  %v563_v11 = vld [vmem:[#allocation7 + $0x38] sm:$0xff]  ;;  %v76_v15 = vld [vmem:[#allocation2 + $0x68] sm:$0xff] }
  0x45   :  { %825 = vmatprep.subr.bf16.mxu1 %v602_v47  ;;  %v73_v14 = vld [vmem:[#allocation2 + $0x50] sm:$0xff]  ;;  %v78_v16 = vld [vmem:[#allocation2 + $0x78] sm:$0xff]  ;;  %v80_v21 = vld [vmem:[#allocation2 + $0x88] sm:$0xff] }
  0x46   :  { %282 = vmatpush1.bf16.msra.mxu0 %v223_v52  ;;  %v127_v52 = vpack.c.bf16 %v65_v35, %v63_v34  ;;  %v77_v20 = vld [vmem:[#allocation2 + $0x70] sm:$0xff]  ;;  %v82_v22 = vld [vmem:[#allocation2 + $0x98] sm:$0xff]  ;;  %v84_v27 = vld [vmem:[#allocation2 + $0xa8] sm:$0xff] }
  0x47   :  { %283 = vmatprep.subr.bf16.mxu0 %v254_v53  ;;  %v594_v53 = vpack.c.bf16 %v569_v49, %v568_v48  ;;  %v81_v26 = vld [vmem:[#allocation2 + $0x90] sm:$0xff]  ;;  %v86_v28 = vld [vmem:[#allocation2 + $0xb8] sm:$0xff]  ;;  %v88_v33 = vld [vmem:[#allocation2 + $0xc8] sm:$0xff] }
  0x48   :  { %v85_v32 = vld [vmem:[#allocation2 + $0xb0] sm:$0xff]  ;;  %v90_v34 = vld [vmem:[#allocation2 + $0xd8] sm:$0xff]  ;;  %v87_v37 = vld [vmem:[#allocation2 + $0xc0] sm:$0xff] }
  0x49   :  { %826 = vmatpush3.bf16.msra.mxu1 %v594_v53  ;;  %v140_v36 = vpack.c.bf16 %v90_v34, %v88_v33  ;;  %v89_v38 = vld [vmem:[#allocation2 + $0xd0] sm:$0xff]  ;;  %v92_v39 = vld [vmem:[#allocation2 + $0xe8] sm:$0xff]  ;;  %v94_v40 = vld [vmem:[#allocation2 + $0xf8] sm:$0xff] }
  0x4a   :  { %284 = vmatpush2.bf16.msra.mxu0 %v253_v58  ;;  %v580_v58 = vld [vmem:[#allocation7 + $0xc0] sm:$0xff]  ;;  %827 = vmatprep.subr.bf16.mxu1 %v601_v55  ;;  %v142_v42 = vpack.c.bf16 %v94_v40, %v92_v39  ;;  %v93_v44 = vld [vmem:[#allocation2 + $0xf0] sm:$0xff]  ;;  %v96_v45 = vld [vmem:[#allocation2 + $0x108] sm:$0xff] }
  0x4b   :  { %285 = vmatprep.subr.bf16.mxu0 %v252_v59  ;;  %v581_v59 = vld [vmem:[#allocation7 + $0xc8] sm:$0xff]  ;;  %v91_v43 = vld [vmem:[#allocation2 + $0xe0] sm:$0xff]  ;;  %v98_v46 = vld [vmem:[#allocation2 + $0x118] sm:$0xff] }
  0x4c   :  { %v141_v47 = vpack.c.bf16 %v93_v44, %v91_v43  ;;  %v144_v48 = vpack.c.bf16 %v98_v46, %v96_v45  ;;  %v95_v49 = vld [vmem:[#allocation2 + $0x100] sm:$0xff]  ;;  %v97_v50 = vld [vmem:[#allocation2 + $0x110] sm:$0xff]  ;;  %v100_v51 = vld [vmem:[#allocation2 + $0x128] sm:$0xff] }
  0x4d   :  { %828 = vmatpush3.bf16.msra.mxu1 %v593_v62  ;;  %v143_v53 = vpack.c.bf16 %v97_v50, %v95_v49  ;;  %v576_v55 = vld [vmem:[#allocation7 + $0xa0] sm:$0xff]  ;;  %v577_v56 = vld [vmem:[#allocation7 + $0xa8] sm:$0xff]  ;;  %v558_v5 = vld [vmem:[#allocation7 + $0x10] sm:$0xff] }
  0x4e   :  { %286 = vmatpush2.bf16.msra.mxu0 %v251_v0  ;;  %v600_v0 = vpack.c.bf16 %v581_v59, %v580_v58  ;;  %v598_v57 = vpack.c.bf16 %v577_v56, %v576_v55  ;;  %v560_v58 = vld [vmem:[#allocation7 + $0x20] sm:$0xff]  ;;  %v561_v59 = vld [vmem:[#allocation7 + $0x28] sm:$0xff]  ;;  %v117_v34 = vld [vmem:[#allocation2 + $0x1b0] sm:$0xff] }
  0x4f   :  { %287 = vmatprep.subr.bf16.mxu0 %v250_v1  ;;  %v564_v1 = vld [vmem:[#allocation7 + $0x40] sm:$0xff]  ;;  %v590_v62 = vpack.c.bf16 %v561_v59, %v560_v58  ;;  %v104_v63 = vld [vmem:[#allocation2 + $0x148] sm:$0xff]  ;;  %v121_v40 = vld [vmem:[#allocation2 + $0x1d0] sm:$0xff] }
  0x50   :  { %829 = vmatprep.subr.bf16.mxu1 %v600_v0  ;;  %v106_v0 = vld [vmem:[#allocation2 + $0x158] sm:$0xff]  ;;  %v115_v33 = vld [vmem:[#allocation2 + $0x1a0] sm:$0xff]  ;;  %v125_v46 = vld [vmem:[#allocation2 + $0x1f0] sm:$0xff] }
  0x51   :  { %v119_v39 = vld [vmem:[#allocation2 + $0x1c0] sm:$0xff] }
  0x52   :  { %288 = vmatpush2.bf16.msra.mxu0 %v249_v6  ;;  %v129_v6 = vpack.c.bf16 %v69_v61, %v67_v60  ;;  %v99_v60 = vld [vmem:[#allocation2 + $0x120] sm:$0xff]  ;;  %v101_v61 = vld [vmem:[#allocation2 + $0x130] sm:$0xff]  ;;  %v155_v43 = vpack.c.bf16 %v121_v40, %v119_v39 }
  0x53   :  { %289 = vmatprep.subr.bf16.mxu0 %v248_v7  ;;  %v592_v7 = vpack.c.bf16 %v565_v2, %v564_v1  ;;  %v574_v1 = vld [vmem:[#allocation7 + $0x90] sm:$0xff]  ;;  %v575_v2 = vld [vmem:[#allocation7 + $0x98] sm:$0xff]  ;;  %v145_v3 = vpack.c.bf16 %v101_v61, %v99_v60  ;;  %v123_v45 = vld [vmem:[#allocation2 + $0x1e0] sm:$0xff] }
  0x54   :  { %v597_v4 = vpack.c.bf16 %v575_v2, %v574_v1 }
  0x55   :  { %830 = vmatpush3.bf16.msra.mxu1 %v592_v7  ;;  %v148_v7 = vpack.c.bf16 %v106_v0, %v104_v63 }
  0x56   :  { %290 = vmatpush2.bf16.msra.mxu0 %v247_v12  ;;  %v591_v12 = vpack.c.bf16 %v563_v11, %v562_v10  ;;  %831 = vmatprep.subr.bf16.mxu1 %v599_v9  ;;  %v572_v9 = vld [vmem:[#allocation7 + $0x80] sm:$0xff]  ;;  %v573_v10 = vld [vmem:[#allocation7 + $0x88] sm:$0xff] }
  0x57   :  { %291 = vmatprep.subr.bf16.mxu0 %v246_v13  ;;  %v71_v13 = vld [vmem:[#allocation2 + $0x40] sm:$0xff]  ;;  %v596_v11 = vpack.c.bf16 %v573_v10, %v572_v9 }
  0x58   :  { %v131_v17 = vpack.c.bf16 %v73_v14, %v71_v13  ;;  %v557_v13 = vld [vmem:[#allocation7 + $0x8] sm:$0xff]  ;;  %v103_v14 = vld [vmem:[#allocation2 + $0x140] sm:$0xff] }
  0x59   :  { %832 = vmatpush3.bf16.msra.mxu1 %v591_v12  ;;  %v556_v12 = vld [vmem:[#allocation7] sm:$0xff] }
  0x5a   :  { %292 = vmatpush2.bf16.msra.mxu0 %v245_v18  ;;  %v134_v18 = vpack.c.bf16 %v78_v16, %v76_v15  ;;  %833 = vmatprep.subr.bf16.mxu1 %v598_v57  ;;  %v105_v15 = vld [vmem:[#allocation2 + $0x150] sm:$0xff]  ;;  %v588_v16 = vpack.c.bf16 %v557_v13, %v556_v12 }
  0x5b   :  { %293 = vmatprep.subr.bf16.mxu0 %v244_v19  ;;  %v75_v19 = vld [vmem:[#allocation2 + $0x60] sm:$0xff] }
  0x5c   :  { %v133_v23 = vpack.c.bf16 %v77_v20, %v75_v19  ;;  %v147_v19 = vpack.c.bf16 %v105_v15, %v103_v14 }
  0x5d   :  { %834 = vmatpush3.bf16.msra.mxu1 %v590_v62 }
  0x5e   :  { %294 = vmatpush2.bf16.msra.mxu0 %v243_v24  ;;  %v136_v24 = vpack.c.bf16 %v82_v22, %v80_v21  ;;  %835 = vmatprep.subr.bf16.mxu1 %v597_v4  ;;  %v107_v21 = vld [vmem:[#allocation2 + $0x160] sm:$0xff]  ;;  %v109_v22 = vld [vmem:[#allocation2 + $0x170] sm:$0xff] }
  0x5f   :  { %295 = vmatprep.subr.bf16.mxu0 %v242_v25  ;;  %v79_v25 = vld [vmem:[#allocation2 + $0x80] sm:$0xff] }
  0x60   :  { %v135_v29 = vpack.c.bf16 %v81_v26, %v79_v25  ;;  %v149_v25 = vpack.c.bf16 %v109_v22, %v107_v21 }
  0x62   :  { %296 = vmatpush2.bf16.msra.mxu0 %v241_v30  ;;  %v138_v30 = vpack.c.bf16 %v86_v28, %v84_v27  ;;  %v111_v27 = vld [vmem:[#allocation2 + $0x180] sm:$0xff]  ;;  %v113_v28 = vld [vmem:[#allocation2 + $0x190] sm:$0xff] }
  0x63   :  { %297 = vmatprep.subr.bf16.mxu0 %v240_v31  ;;  %v83_v31 = vld [vmem:[#allocation2 + $0xa0] sm:$0xff] }
  0x64   :  { %v137_v35 = vpack.c.bf16 %v85_v32, %v83_v31  ;;  %v151_v31 = vpack.c.bf16 %v113_v28, %v111_v27 }
  0x66   :  { %298 = vmatpush2.bf16.msra.mxu0 %v239_v41  ;;  %v139_v41 = vpack.c.bf16 %v89_v38, %v87_v37  ;;  %v153_v37 = vpack.c.bf16 %v117_v34, %v115_v33 }
  0x69   :  { %300 = vmatmul.mubr.bf16.vlgmr.msra.gmra.mxu0 %v127_v52  ;;  %v102_v52 = vld [vmem:[#allocation2 + $0x138] sm:$0xff] }
  0x6a   :  { %309 = vmatprep.mubr.bf16.mxu0 %v130_v54  ;;  %v146_v54 = vpack.c.bf16 %v102_v52, %v100_v51  ;;  %v255_v52 = vld [vmem:[%s1195_s2] sm:$0x3] }
  0x71   :  { %310 = vmatmul.mubr.bf16.gmra.mxu0 %v129_v6  ;;  %v559_v6 = vld [vmem:[#allocation7 + $0x18] sm:$0xff] }
  0x72   :  { %319 = vmatprep.mubr.bf16.mxu0 %v132_v8  ;;  %v589_v8 = vpack.c.bf16 %v559_v6, %v558_v5 }
  0x74   :  { %836 = vmatpush3.bf16.msra.mxu1 %v589_v8 }
  0x75   :  { %837 = vmatprep.subr.bf16.mxu1 %v596_v11 }
  0x78   :  { %838 = vmatpush3.bf16.msra.mxu1 %v588_v16 }
  0x79   :  { %320 = vmatmul.mubr.bf16.gmra.mxu0 %v131_v17  ;;  %v108_v17 = vld [vmem:[#allocation2 + $0x168] sm:$0xff] }
  0x7a   :  { %329 = vmatprep.mubr.bf16.mxu0 %v134_v18  ;;  %v110_v18 = vld [vmem:[#allocation2 + $0x178] sm:$0xff] }
  0x7b   :  { %v150_v20 = vpack.c.bf16 %v110_v18, %v108_v17 }
  0x81   :  { %330 = vmatmul.mubr.bf16.gmra.mxu0 %v133_v23  ;;  %v112_v23 = vld [vmem:[#allocation2 + $0x188] sm:$0xff] }
  0x82   :  { %339 = vmatprep.mubr.bf16.mxu0 %v136_v24  ;;  %v114_v24 = vld [vmem:[#allocation2 + $0x198] sm:$0xff] }
  0x83   :  { %v152_v26 = vpack.c.bf16 %v114_v24, %v112_v23 }
  0x89   :  { %340 = vmatmul.mubr.bf16.gmra.mxu0 %v135_v29  ;;  %v116_v29 = vld [vmem:[#allocation2 + $0x1a8] sm:$0xff] }
  0x8a   :  { %349 = vmatprep.mubr.bf16.mxu0 %v138_v30  ;;  %v118_v30 = vld [vmem:[#allocation2 + $0x1b8] sm:$0xff] }
  0x8b   :  { %v154_v32 = vpack.c.bf16 %v118_v30, %v116_v29 }
  0x91   :  { %350 = vmatmul.mubr.bf16.gmra.mxu0 %v137_v35  ;;  %v120_v35 = vld [vmem:[#allocation2 + $0x1c8] sm:$0xff] }
  0x92   :  { %359 = vmatprep.mubr.bf16.mxu0 %v140_v36  ;;  %v122_v36 = vld [vmem:[#allocation2 + $0x1d8] sm:$0xff] }
  0x93   :  { %v156_v38 = vpack.c.bf16 %v122_v36, %v120_v35 }
  0x99   :  { %360 = vmatmul.mubr.bf16.gmra.mxu0 %v139_v41  ;;  %v124_v41 = vld [vmem:[#allocation2 + $0x1e8] sm:$0xff] }
  0x9a   :  { %369 = vmatprep.mubr.bf16.mxu0 %v142_v42  ;;  %v126_v42 = vld [vmem:[#allocation2 + $0x1f8] sm:$0xff] }
  0x9b   :  { %v158_v44 = vpack.c.bf16 %v126_v42, %v124_v41 }
  0xa1   :  { %370 = vmatmul.mubr.bf16.gmra.mxu0 %v141_v47  ;;  %v157_v47 = vpack.c.bf16 %v125_v46, %v123_v45 }
  0xa2   :  { %379 = vmatprep.mubr.bf16.mxu0 %v144_v48  ;;  %v257_v48 = vlaneseq }
  0xa4   :  { %v258_v49 = vshrl.u32 %v257_v48, 7 }
  0xa6   :  { %v263_v50 = vsub.s32 1, %v258_v49  ;;  %v259_v51 = vsub.s32 0, %v258_v49 }
  0xa8   :  { %v1084_v55 = vrot.slane %v255_v52, %v259_v51 }
  0xa9   :  { %380 = vmatmul.mubr.bf16.gmra.mxu0 %v143_v53 }
  0xaa   :  { %389 = vmatprep.mubr.bf16.mxu0 %v146_v54  ;;  %v1082_v54 = vrot.slane %v255_v52, %v263_v50 }
  0xb1   :  { %390 = vmatmul.mubr.bf16.gmra.mxu0 %v145_v3 }
  0xb2   :  { %399 = vmatprep.mubr.bf16.mxu0 %v148_v7 }
  0xb9   :  { %400 = vmatmul.mubr.bf16.gmra.mxu0 %v147_v19 }
  0xba   :  { %409 = vmatprep.mubr.bf16.mxu0 %v150_v20 }
  0xc1   :  { %410 = vmatmul.mubr.bf16.gmra.mxu0 %v149_v25 }
  0xc2   :  { %419 = vmatprep.mubr.bf16.mxu0 %v152_v26 }
  0xc9   :  { %420 = vmatmul.mubr.bf16.gmra.mxu0 %v151_v31 }
  0xca   :  { %429 = vmatprep.mubr.bf16.mxu0 %v154_v32 }
  0xd1   :  { %430 = vmatmul.mubr.bf16.gmra.mxu0 %v153_v37 }
  0xd2   :  { %439 = vmatprep.mubr.bf16.mxu0 %v156_v38 }
  0xd9   :  { %440 = vmatmul.mubr.bf16.gmra.mxu0 %v155_v43 }
  0xda   :  { %449 = vmatprep.mubr.bf16.mxu0 %v158_v44 }
  0xe1   :  { %450 = vmatmul.mubr.bf16.gmra.mxu0 %v157_v47 }
 0x129   :  { %v301_v53 = vpop.f32.mrf.mxu0 }
 0x12a   :  { %v302_v60 = vadd.f32 %v301_v53, %v1084_v55 }
 0x12b   :  { %v303_v56 = vpop.f32.mrf.mxu0 }
 0x12c   :  { %v304_v58 = vadd.f32 %v303_v56, %v1082_v54  ;;  %v460_v3 = vmax.f32 %v302_v60, 0.0 }
 0x12d   :  { %v305_v57 = vpop.f32.mrf.mxu0 }
 0x12e   :  { %v306_v59 = vadd.f32 %v305_v57, %v1084_v55  ;;  %v461_v1 = vmax.f32 %v304_v58, 0.0 }
 0x12f   :  { %v307_v61 = vpop.f32.mrf.mxu0 }
 0x130   :  { %v308_v62 = vadd.f32 %v307_v61, %v1082_v54  ;;  %v462_v63 = vmax.f32 %v306_v59, 0.0 }
 0x131   :  { %v311_v0 = vpop.f32.mrf.mxu0 }
 0x132   :  { %v463_v2 = vmax.f32 %v308_v62, 0.0  ;;  %v524_v6 = vpack.c.bf16 %v462_v63, %v460_v3  ;;  %v312_v10 = vadd.f32 %v311_v0, %v1084_v55 }
 0x133   :  { %v313_v4 = vpop.f32.mrf.mxu0 }
 0x134   :  { %v525_v5 = vpack.c.bf16 %v463_v2, %v461_v1  ;;  %v314_v8 = vadd.f32 %v313_v4, %v1082_v54  ;;  %v464_v17 = vmax.f32 %v312_v10, 0.0 }
 0x135   :  { %v315_v7 = vpop.f32.mrf.mxu0 }
 0x136   :  { %v316_v9 = vadd.f32 %v315_v7, %v1084_v55  ;;  %643 = vmatprep.mubr.bf16.mxu1 %v525_v5  ;;  %v465_v15 = vmax.f32 %v314_v8, 0.0 }
 0x137   :  { %v317_v11 = vpop.f32.mrf.mxu0  ;;  %644 = vmatmul.mubr.bf16.vlgmr.msra.gmra.mxu1 %v524_v6 }
 0x138   :  { %v318_v12 = vadd.f32 %v317_v11, %v1082_v54  ;;  %v466_v13 = vmax.f32 %v316_v9, 0.0 }
 0x139   :  { %v321_v14 = vpop.f32.mrf.mxu0 }
 0x13a   :  { %v467_v16 = vmax.f32 %v318_v12, 0.0  ;;  %v526_v20 = vpack.c.bf16 %v466_v13, %v464_v17  ;;  %v322_v24 = vadd.f32 %v321_v14, %v1084_v55 }
 0x13b   :  { %v323_v18 = vpop.f32.mrf.mxu0 }
 0x13c   :  { %v527_v19 = vpack.c.bf16 %v467_v16, %v465_v15  ;;  %v324_v22 = vadd.f32 %v323_v18, %v1082_v54  ;;  %v468_v31 = vmax.f32 %v322_v24, 0.0 }
 0x13d   :  { %v325_v21 = vpop.f32.mrf.mxu0 }
 0x13e   :  { %v326_v23 = vadd.f32 %v325_v21, %v1084_v55  ;;  %651 = vmatprep.mubr.bf16.mxu1 %v527_v19  ;;  %v469_v29 = vmax.f32 %v324_v22, 0.0 }
 0x13f   :  { %v327_v25 = vpop.f32.mrf.mxu0  ;;  %652 = vmatmul.mubr.bf16.gmra.mxu1 %v526_v20 }
 0x140   :  { %v328_v26 = vadd.f32 %v327_v25, %v1082_v54  ;;  %v470_v27 = vmax.f32 %v326_v23, 0.0 }
 0x141   :  { %v331_v28 = vpop.f32.mrf.mxu0 }
 0x142   :  { %v471_v30 = vmax.f32 %v328_v26, 0.0  ;;  %v528_v34 = vpack.c.bf16 %v470_v27, %v468_v31  ;;  %v332_v38 = vadd.f32 %v331_v28, %v1084_v55 }
 0x143   :  { %v333_v32 = vpop.f32.mrf.mxu0 }
 0x144   :  { %v529_v33 = vpack.c.bf16 %v471_v30, %v469_v29  ;;  %v334_v36 = vadd.f32 %v333_v32, %v1082_v54  ;;  %v472_v45 = vmax.f32 %v332_v38, 0.0 }
 0x145   :  { %v335_v35 = vpop.f32.mrf.mxu0 }
 0x146   :  { %v336_v37 = vadd.f32 %v335_v35, %v1084_v55  ;;  %659 = vmatprep.mubr.bf16.mxu1 %v529_v33  ;;  %v473_v43 = vmax.f32 %v334_v36, 0.0 }
 0x147   :  { %v337_v39 = vpop.f32.mrf.mxu0  ;;  %660 = vmatmul.mubr.bf16.gmra.mxu1 %v528_v34 }
 0x148   :  { %v338_v40 = vadd.f32 %v337_v39, %v1082_v54  ;;  %v474_v41 = vmax.f32 %v336_v37, 0.0 }
 0x149   :  { %v341_v42 = vpop.f32.mrf.mxu0 }
 0x14a   :  { %v475_v44 = vmax.f32 %v338_v40, 0.0  ;;  %v530_v48 = vpack.c.bf16 %v474_v41, %v472_v45  ;;  %v342_v52 = vadd.f32 %v341_v42, %v1084_v55 }
 0x14b   :  { %v343_v46 = vpop.f32.mrf.mxu0 }
 0x14c   :  { %v531_v47 = vpack.c.bf16 %v475_v44, %v473_v43  ;;  %v344_v50 = vadd.f32 %v343_v46, %v1082_v54  ;;  %v476_v61 = vmax.f32 %v342_v52, 0.0 }
 0x14d   :  { %v345_v49 = vpop.f32.mrf.mxu0 }
 0x14e   :  { %v346_v51 = vadd.f32 %v345_v49, %v1084_v55  ;;  %667 = vmatprep.mubr.bf16.mxu1 %v531_v47  ;;  %v477_v59 = vmax.f32 %v344_v50, 0.0 }
 0x14f   :  { %v347_v53 = vpop.f32.mrf.mxu0  ;;  %668 = vmatmul.mubr.bf16.gmra.mxu1 %v530_v48 }
 0x150   :  { %v348_v56 = vadd.f32 %v347_v53, %v1082_v54  ;;  %v478_v57 = vmax.f32 %v346_v51, 0.0 }
 0x151   :  { %v351_v58 = vpop.f32.mrf.mxu0 }
 0x152   :  { %v479_v60 = vmax.f32 %v348_v56, 0.0  ;;  %v532_v0 = vpack.c.bf16 %v478_v57, %v476_v61  ;;  %v352_v4 = vadd.f32 %v351_v58, %v1084_v55 }
 0x153   :  { %v353_v62 = vpop.f32.mrf.mxu0 }
 0x154   :  { %v533_v63 = vpack.c.bf16 %v479_v60, %v477_v59  ;;  %v354_v2 = vadd.f32 %v353_v62, %v1082_v54  ;;  %v480_v11 = vmax.f32 %v352_v4, 0.0 }
 0x155   :  { %v355_v1 = vpop.f32.mrf.mxu0 }
 0x156   :  { %v356_v3 = vadd.f32 %v355_v1, %v1084_v55  ;;  %675 = vmatprep.mubr.bf16.mxu1 %v533_v63  ;;  %v481_v9 = vmax.f32 %v354_v2, 0.0 }
 0x157   :  { %v357_v5 = vpop.f32.mrf.mxu0  ;;  %676 = vmatmul.mubr.bf16.gmra.mxu1 %v532_v0 }
 0x158   :  { %v358_v6 = vadd.f32 %v357_v5, %v1082_v54  ;;  %v482_v7 = vmax.f32 %v356_v3, 0.0 }
 0x159   :  { %v361_v8 = vpop.f32.mrf.mxu0 }
 0x15a   :  { %v483_v10 = vmax.f32 %v358_v6, 0.0  ;;  %v534_v14 = vpack.c.bf16 %v482_v7, %v480_v11  ;;  %v362_v18 = vadd.f32 %v361_v8, %v1084_v55 }
 0x15b   :  { %v363_v12 = vpop.f32.mrf.mxu0 }
 0x15c   :  { %v535_v13 = vpack.c.bf16 %v483_v10, %v481_v9  ;;  %v364_v16 = vadd.f32 %v363_v12, %v1082_v54  ;;  %v484_v25 = vmax.f32 %v362_v18, 0.0 }
 0x15d   :  { %v365_v15 = vpop.f32.mrf.mxu0 }
 0x15e   :  { %v366_v17 = vadd.f32 %v365_v15, %v1084_v55  ;;  %683 = vmatprep.mubr.bf16.mxu1 %v535_v13  ;;  %v485_v23 = vmax.f32 %v364_v16, 0.0 }
 0x15f   :  { %v367_v19 = vpop.f32.mrf.mxu0  ;;  %684 = vmatmul.mubr.bf16.gmra.mxu1 %v534_v14 }
 0x160   :  { %v368_v20 = vadd.f32 %v367_v19, %v1082_v54  ;;  %v486_v21 = vmax.f32 %v366_v17, 0.0 }
 0x161   :  { %v371_v22 = vpop.f32.mrf.mxu0 }
 0x162   :  { %v487_v24 = vmax.f32 %v368_v20, 0.0  ;;  %v536_v28 = vpack.c.bf16 %v486_v21, %v484_v25  ;;  %v372_v32 = vadd.f32 %v371_v22, %v1084_v55 }
 0x163   :  { %v373_v26 = vpop.f32.mrf.mxu0 }
 0x164   :  { %v537_v27 = vpack.c.bf16 %v487_v24, %v485_v23  ;;  %v374_v30 = vadd.f32 %v373_v26, %v1082_v54  ;;  %v488_v39 = vmax.f32 %v372_v32, 0.0 }
 0x165   :  { %v375_v29 = vpop.f32.mrf.mxu0 }
 0x166   :  { %v376_v31 = vadd.f32 %v375_v29, %v1084_v55  ;;  %691 = vmatprep.mubr.bf16.mxu1 %v537_v27  ;;  %v489_v37 = vmax.f32 %v374_v30, 0.0 }
 0x167   :  { %v377_v33 = vpop.f32.mrf.mxu0  ;;  %692 = vmatmul.mubr.bf16.gmra.mxu1 %v536_v28 }
 0x168   :  { %v378_v34 = vadd.f32 %v377_v33, %v1082_v54  ;;  %v490_v35 = vmax.f32 %v376_v31, 0.0 }
 0x169   :  { %v381_v36 = vpop.f32.mrf.mxu0 }
 0x16a   :  { %v491_v38 = vmax.f32 %v378_v34, 0.0  ;;  %v538_v42 = vpack.c.bf16 %v490_v35, %v488_v39  ;;  %v382_v46 = vadd.f32 %v381_v36, %v1084_v55 }
 0x16b   :  { %v383_v40 = vpop.f32.mrf.mxu0 }
 0x16c   :  { %v539_v41 = vpack.c.bf16 %v491_v38, %v489_v37  ;;  %v384_v44 = vadd.f32 %v383_v40, %v1082_v54  ;;  %v492_v53 = vmax.f32 %v382_v46, 0.0 }
 0x16d   :  { %v385_v43 = vpop.f32.mrf.mxu0 }
 0x16e   :  { %v386_v45 = vadd.f32 %v385_v43, %v1084_v55  ;;  %699 = vmatprep.mubr.bf16.mxu1 %v539_v41  ;;  %v493_v51 = vmax.f32 %v384_v44, 0.0 }
 0x16f   :  { %v387_v47 = vpop.f32.mrf.mxu0  ;;  %700 = vmatmul.mubr.bf16.gmra.mxu1 %v538_v42 }
 0x170   :  { %v388_v48 = vadd.f32 %v387_v47, %v1082_v54  ;;  %v494_v49 = vmax.f32 %v386_v45, 0.0 }
 0x171   :  { %v391_v50 = vpop.f32.mrf.mxu0 }
 0x172   :  { %v495_v52 = vmax.f32 %v388_v48, 0.0  ;;  %v540_v58 = vpack.c.bf16 %v494_v49, %v492_v53  ;;  %v392_v62 = vadd.f32 %v391_v50, %v1084_v55 }
 0x173   :  { %v393_v56 = vpop.f32.mrf.mxu0 }
 0x174   :  { %v541_v57 = vpack.c.bf16 %v495_v52, %v493_v51  ;;  %v394_v60 = vadd.f32 %v393_v56, %v1082_v54  ;;  %v496_v5 = vmax.f32 %v392_v62, 0.0 }
 0x175   :  { %v395_v59 = vpop.f32.mrf.mxu0 }
 0x176   :  { %v396_v61 = vadd.f32 %v395_v59, %v1084_v55  ;;  %707 = vmatprep.mubr.bf16.mxu1 %v541_v57  ;;  %v497_v3 = vmax.f32 %v394_v60, 0.0 }
 0x177   :  { %v397_v63 = vpop.f32.mrf.mxu0  ;;  %708 = vmatmul.mubr.bf16.gmra.mxu1 %v540_v58 }
 0x178   :  { %v398_v0 = vadd.f32 %v397_v63, %v1082_v54  ;;  %v498_v1 = vmax.f32 %v396_v61, 0.0 }
 0x179   :  { %v401_v2 = vpop.f32.mrf.mxu0 }
 0x17a   :  { %v499_v4 = vmax.f32 %v398_v0, 0.0  ;;  %v542_v8 = vpack.c.bf16 %v498_v1, %v496_v5  ;;  %v402_v12 = vadd.f32 %v401_v2, %v1084_v55 }
 0x17b   :  { %v403_v6 = vpop.f32.mrf.mxu0 }
 0x17c   :  { %v543_v7 = vpack.c.bf16 %v499_v4, %v497_v3  ;;  %v404_v10 = vadd.f32 %v403_v6, %v1082_v54  ;;  %v500_v19 = vmax.f32 %v402_v12, 0.0 }
 0x17d   :  { %v405_v9 = vpop.f32.mrf.mxu0 }
 0x17e   :  { %v406_v11 = vadd.f32 %v405_v9, %v1084_v55  ;;  %715 = vmatprep.mubr.bf16.mxu1 %v543_v7  ;;  %v501_v17 = vmax.f32 %v404_v10, 0.0 }
 0x17f   :  { %v407_v13 = vpop.f32.mrf.mxu0  ;;  %716 = vmatmul.mubr.bf16.gmra.mxu1 %v542_v8 }
 0x180   :  { %v408_v14 = vadd.f32 %v407_v13, %v1082_v54  ;;  %v502_v15 = vmax.f32 %v406_v11, 0.0 }
 0x181   :  { %v411_v16 = vpop.f32.mrf.mxu0 }
 0x182   :  { %v503_v18 = vmax.f32 %v408_v14, 0.0  ;;  %v544_v22 = vpack.c.bf16 %v502_v15, %v500_v19  ;;  %v412_v26 = vadd.f32 %v411_v16, %v1084_v55 }
 0x183   :  { %v413_v20 = vpop.f32.mrf.mxu0 }
 0x184   :  { %v545_v21 = vpack.c.bf16 %v503_v18, %v501_v17  ;;  %v414_v24 = vadd.f32 %v413_v20, %v1082_v54  ;;  %v504_v33 = vmax.f32 %v412_v26, 0.0 }
 0x185   :  { %v415_v23 = vpop.f32.mrf.mxu0 }
 0x186   :  { %v416_v25 = vadd.f32 %v415_v23, %v1084_v55  ;;  %723 = vmatprep.mubr.bf16.mxu1 %v545_v21  ;;  %v505_v31 = vmax.f32 %v414_v24, 0.0 }
 0x187   :  { %v417_v27 = vpop.f32.mrf.mxu0  ;;  %724 = vmatmul.mubr.bf16.gmra.mxu1 %v544_v22 }
 0x188   :  { %v418_v28 = vadd.f32 %v417_v27, %v1082_v54  ;;  %v506_v29 = vmax.f32 %v416_v25, 0.0 }
 0x189   :  { %v421_v30 = vpop.f32.mrf.mxu0 }
 0x18a   :  { %v507_v32 = vmax.f32 %v418_v28, 0.0  ;;  %v546_v36 = vpack.c.bf16 %v506_v29, %v504_v33  ;;  %v422_v40 = vadd.f32 %v421_v30, %v1084_v55  ;;  %v1153_v30 = vld [vmem:[%s1197_s4] ss:$0 sm:$0xff]  ;;  %s1036_s4 = smov [#allocation8]  }
 0x18b   :  { %v423_v34 = vpop.f32.mrf.mxu0  ;;  %s809_s12 = sshll.u32 %s1036_s4, 4  ;;  %s810_s12 = int_to_ptr.vmem [resolvable:$true] %s809_s12 }
 0x18c   :  { %v547_v35 = vpack.c.bf16 %v507_v32, %v505_v31  ;;  %v424_v38 = vadd.f32 %v423_v34, %v1082_v54  ;;  %v508_v47 = vmax.f32 %v422_v40, 0.0  ;;  %s1003_s13 = scalar_lea.vmem %s810_s12, 4096  ;;  %p1008_p2 = scmp.lt.s32.totalorder %s810_s12, %s810_s12 }
 0x18d   :  { %v425_v37 = vpop.f32.mrf.mxu0  ;;  %p1004_p1 = scmp.ne.s32.totalorder %s810_s12, %s1003_s13  ;;  %p1009_p3 = scmp.lt.s32.totalorder %s1003_s13, %s1003_s13 }
 0x18e   :  { %v426_v39 = vadd.f32 %v425_v37, %v1084_v55  ;;  %731 = vmatprep.mubr.bf16.mxu1 %v547_v35  ;;  %v509_v45 = vmax.f32 %v424_v38, 0.0 }
 0x18f   :  { %v427_v41 = vpop.f32.mrf.mxu0  ;;  %732 = vmatmul.mubr.bf16.gmra.mxu1 %v546_v36  ;;  %p1010_p4 = por %p1009_p3, %p1008_p2 }
 0x190   :  { %v428_v42 = vadd.f32 %v427_v41, %v1082_v54  ;;  %v510_v43 = vmax.f32 %v426_v39, 0.0 }
 0x191   :  { %v431_v44 = vpop.f32.mrf.mxu0  ;;  %p1011_p5 = pnand %p1010_p4, %p1004_p1 }
 0x192   :  { %v511_v46 = vmax.f32 %v428_v42, 0.0  ;;  %v548_v50 = vpack.c.bf16 %v510_v43, %v508_v47  ;;  %v432_v56 = vadd.f32 %v431_v44, %v1084_v55 }
 0x193   :  { %v433_v48 = vpop.f32.mrf.mxu0 }
 0x194   :  { %v549_v49 = vpack.c.bf16 %v511_v46, %v509_v45  ;;  %v434_v52 = vadd.f32 %v433_v48, %v1082_v54  ;;  %v512_v63 = vmax.f32 %v432_v56, 0.0 }
 0x195   :  { %v435_v51 = vpop.f32.mrf.mxu0 }
 0x196   :  { %v436_v53 = vadd.f32 %v435_v51, %v1084_v55  ;;  %739 = vmatprep.mubr.bf16.mxu1 %v549_v49  ;;  %v513_v61 = vmax.f32 %v434_v52, 0.0 }
 0x197   :  { %v437_v57 = vpop.f32.mrf.mxu0  ;;  %740 = vmatmul.mubr.bf16.gmra.mxu1 %v548_v50 }
 0x198   :  { %v438_v58 = vadd.f32 %v437_v57, %v1082_v54  ;;  %v514_v59 = vmax.f32 %v436_v53, 0.0 }
 0x199   :  { %v441_v60 = vpop.f32.mrf.mxu0 }
 0x19a   :  { %v515_v62 = vmax.f32 %v438_v58, 0.0  ;;  %v550_v2 = vpack.c.bf16 %v514_v59, %v512_v63  ;;  %v442_v6 = vadd.f32 %v441_v60, %v1084_v55 }
 0x19b   :  { %v443_v0 = vpop.f32.mrf.mxu0 }
 0x19c   :  { %v551_v1 = vpack.c.bf16 %v515_v62, %v513_v61  ;;  %v444_v4 = vadd.f32 %v443_v0, %v1082_v54  ;;  %v516_v13 = vmax.f32 %v442_v6, 0.0 }
 0x19d   :  { %v445_v3 = vpop.f32.mrf.mxu0 }
 0x19e   :  { %v446_v5 = vadd.f32 %v445_v3, %v1084_v55  ;;  %747 = vmatprep.mubr.bf16.mxu1 %v551_v1  ;;  %v517_v11 = vmax.f32 %v444_v4, 0.0 }
 0x19f   :  { %v447_v7 = vpop.f32.mrf.mxu0  ;;  %748 = vmatmul.mubr.bf16.gmra.mxu1 %v550_v2 }
 0x1a0   :  { %v448_v8 = vadd.f32 %v447_v7, %v1082_v54  ;;  %v518_v9 = vmax.f32 %v446_v5, 0.0 }
 0x1a1   :  { %v451_v10 = vpop.f32.mrf.mxu0 }
 0x1a2   :  { %v519_v12 = vmax.f32 %v448_v8, 0.0  ;;  %v552_v16 = vpack.c.bf16 %v518_v9, %v516_v13  ;;  %v452_v20 = vadd.f32 %v451_v10, %v1084_v55 }
 0x1a3   :  { %v453_v14 = vpop.f32.mrf.mxu0 }
 0x1a4   :  { %v553_v15 = vpack.c.bf16 %v519_v12, %v517_v11  ;;  %v454_v18 = vadd.f32 %v453_v14, %v1082_v54  ;;  %v520_v26 = vmax.f32 %v452_v20, 0.0 }
 0x1a5   :  { %v455_v17 = vpop.f32.mrf.mxu0 }
 0x1a6   :  { %v456_v19 = vadd.f32 %v455_v17, %v1084_v55  ;;  %755 = vmatprep.mubr.bf16.mxu1 %v553_v15  ;;  %v521_v24 = vmax.f32 %v454_v18, 0.0 }
 0x1a7   :  { %v457_v21 = vpop.f32.mrf.mxu0  ;;  %756 = vmatmul.mubr.bf16.gmra.mxu1 %v552_v16 }
 0x1a8   :  { %v458_v22 = vadd.f32 %v457_v21, %v1082_v54  ;;  %v522_v23 = vmax.f32 %v456_v19, 0.0 }
 0x1aa   :  { %v523_v25 = vmax.f32 %v458_v22, 0.0  ;;  %v554_v28 = vpack.c.bf16 %v522_v23, %v520_v26 }
 0x1ac   :  { %v555_v27 = vpack.c.bf16 %v523_v25, %v521_v24 }
 0x1ae   :  { %763 = vmatprep.mubr.bf16.mxu1 %v555_v27 }
 0x1af   :  { %764 = vmatmul.mubr.bf16.gmra.mxu1 %v554_v28 }
 0x1f7   :  { %v839_v29 = vpop.f32.mrf.mxu1 }
 0x1f9   :  { %v840_v31 = vpop.f32.mrf.mxu1 }
 0x1fa   :  { %v841_v55 = vadd.f32 %v840_v31, %v839_v29 }
 0x1fb   :  { %v842_v32 = vpop.f32.mrf.mxu1 }
 0x1fc   :  { %v646_v33 = vadd.f32 %v841_v55, %v1153_v30 }
 0x1fd   :  { %v843_v54 = vpop.f32.mrf.mxu1 }
 0x1fe   :  { %772 = vst [vmem:[#allocation8] sm:$0xff] %v646_v33  ;;  %v844_v34 = vadd.f32 %v843_v54, %v842_v32 }
 0x1ff   :  { %v845_v35 = vpop.f32.mrf.mxu1 }
 0x200   :  { %v649_v36 = vadd.f32 %v844_v34, %v1153_v30 }
 0x201   :  { %v846_v37 = vpop.f32.mrf.mxu1 }
 0x202   :  { %773 = vst [vmem:[#allocation8 + $0x8] sm:$0xff] %v649_v36  ;;  %v847_v38 = vadd.f32 %v846_v37, %v845_v35 }
 0x203   :  { %v848_v39 = vpop.f32.mrf.mxu1 }
 0x204   :  { %v654_v40 = vadd.f32 %v847_v38, %v1153_v30 }
 0x205   :  { %v849_v41 = vpop.f32.mrf.mxu1 }
 0x206   :  { %774 = vst [vmem:[#allocation8 + $0x10] sm:$0xff] %v654_v40  ;;  %v850_v42 = vadd.f32 %v849_v41, %v848_v39 }
 0x207   :  { %v851_v43 = vpop.f32.mrf.mxu1 }
 0x208   :  { %v657_v44 = vadd.f32 %v850_v42, %v1153_v30 }
 0x209   :  { %v852_v45 = vpop.f32.mrf.mxu1 }
 0x20a   :  { %775 = vst [vmem:[#allocation8 + $0x18] sm:$0xff] %v657_v44  ;;  %v853_v46 = vadd.f32 %v852_v45, %v851_v43 }
 0x20b   :  { %v854_v47 = vpop.f32.mrf.mxu1 }
 0x20c   :  { %v662_v48 = vadd.f32 %v853_v46, %v1153_v30 }
 0x20d   :  { %v855_v49 = vpop.f32.mrf.mxu1 }
 0x20e   :  { %776 = vst [vmem:[#allocation8 + $0x20] sm:$0xff] %v662_v48  ;;  %v856_v50 = vadd.f32 %v855_v49, %v854_v47 }
 0x20f   :  { %v857_v51 = vpop.f32.mrf.mxu1 }
 0x210   :  { %v665_v52 = vadd.f32 %v856_v50, %v1153_v30 }
 0x211   :  { %v858_v53 = vpop.f32.mrf.mxu1 }
 0x212   :  { %777 = vst [vmem:[#allocation8 + $0x28] sm:$0xff] %v665_v52  ;;  %v859_v56 = vadd.f32 %v858_v53, %v857_v51 }
 0x213   :  { %v860_v57 = vpop.f32.mrf.mxu1 }
 0x214   :  { %v670_v58 = vadd.f32 %v859_v56, %v1153_v30 }
 0x215   :  { %v861_v59 = vpop.f32.mrf.mxu1 }
 0x216   :  { %778 = vst [vmem:[#allocation8 + $0x30] sm:$0xff] %v670_v58  ;;  %v862_v60 = vadd.f32 %v861_v59, %v860_v57 }
 0x217   :  { %v863_v61 = vpop.f32.mrf.mxu1 }
 0x218   :  { %v673_v62 = vadd.f32 %v862_v60, %v1153_v30 }
 0x219   :  { %v864_v63 = vpop.f32.mrf.mxu1 }
 0x21a   :  { %779 = vst [vmem:[#allocation8 + $0x38] sm:$0xff] %v673_v62  ;;  %v865_v0 = vadd.f32 %v864_v63, %v863_v61 }
 0x21b   :  { %v866_v1 = vpop.f32.mrf.mxu1 }
 0x21c   :  { %v678_v2 = vadd.f32 %v865_v0, %v1153_v30 }
 0x21d   :  { %v867_v3 = vpop.f32.mrf.mxu1 }
 0x21e   :  { %780 = vst [vmem:[#allocation8 + $0x40] sm:$0xff] %v678_v2  ;;  %v868_v4 = vadd.f32 %v867_v3, %v866_v1 }
 0x21f   :  { %v869_v5 = vpop.f32.mrf.mxu1 }
 0x220   :  { %v681_v6 = vadd.f32 %v868_v4, %v1153_v30 }
 0x221   :  { %v870_v7 = vpop.f32.mrf.mxu1 }
 0x222   :  { %781 = vst [vmem:[#allocation8 + $0x48] sm:$0xff] %v681_v6  ;;  %v871_v8 = vadd.f32 %v870_v7, %v869_v5 }
 0x223   :  { %v872_v9 = vpop.f32.mrf.mxu1 }
 0x224   :  { %v686_v10 = vadd.f32 %v871_v8, %v1153_v30 }
 0x225   :  { %v873_v11 = vpop.f32.mrf.mxu1 }
 0x226   :  { %782 = vst [vmem:[#allocation8 + $0x50] sm:$0xff] %v686_v10  ;;  %v874_v12 = vadd.f32 %v873_v11, %v872_v9 }
 0x227   :  { %v875_v13 = vpop.f32.mrf.mxu1 }
 0x228   :  { %v689_v14 = vadd.f32 %v874_v12, %v1153_v30 }
 0x229   :  { %v876_v15 = vpop.f32.mrf.mxu1 }
 0x22a   :  { %783 = vst [vmem:[#allocation8 + $0x58] sm:$0xff] %v689_v14  ;;  %v877_v16 = vadd.f32 %v876_v15, %v875_v13 }
 0x22b   :  { %v878_v17 = vpop.f32.mrf.mxu1 }
 0x22c   :  { %v694_v18 = vadd.f32 %v877_v16, %v1153_v30 }
 0x22d   :  { %v879_v19 = vpop.f32.mrf.mxu1 }
 0x22e   :  { %784 = vst [vmem:[#allocation8 + $0x60] sm:$0xff] %v694_v18  ;;  %v880_v20 = vadd.f32 %v879_v19, %v878_v17 }
 0x22f   :  { %v881_v21 = vpop.f32.mrf.mxu1 }
 0x230   :  { %v697_v22 = vadd.f32 %v880_v20, %v1153_v30 }
 0x231   :  { %v882_v23 = vpop.f32.mrf.mxu1 }
 0x232   :  { %785 = vst [vmem:[#allocation8 + $0x68] sm:$0xff] %v697_v22  ;;  %v883_v24 = vadd.f32 %v882_v23, %v881_v21 }
 0x233   :  { %v884_v25 = vpop.f32.mrf.mxu1 }
 0x234   :  { %v702_v26 = vadd.f32 %v883_v24, %v1153_v30 }
 0x235   :  { %v885_v27 = vpop.f32.mrf.mxu1 }
 0x236   :  { %786 = vst [vmem:[#allocation8 + $0x70] sm:$0xff] %v702_v26  ;;  %v886_v28 = vadd.f32 %v885_v27, %v884_v25 }
 0x237   :  { %v887_v29 = vpop.f32.mrf.mxu1 }
 0x238   :  { %v705_v31 = vadd.f32 %v886_v28, %v1153_v30 }
 0x239   :  { %v888_v55 = vpop.f32.mrf.mxu1 }
 0x23a   :  { %787 = vst [vmem:[#allocation8 + $0x78] sm:$0xff] %v705_v31  ;;  %v889_v32 = vadd.f32 %v888_v55, %v887_v29 }
 0x23b   :  { %v890_v33 = vpop.f32.mrf.mxu1 }
 0x23c   :  { %v710_v54 = vadd.f32 %v889_v32, %v1153_v30 }
 0x23d   :  { %v891_v34 = vpop.f32.mrf.mxu1 }
 0x23e   :  { %788 = vst [vmem:[#allocation8 + $0x80] sm:$0xff] %v710_v54  ;;  %v892_v35 = vadd.f32 %v891_v34, %v890_v33 }
 0x23f   :  { %v893_v36 = vpop.f32.mrf.mxu1 }
 0x240   :  { %v713_v37 = vadd.f32 %v892_v35, %v1153_v30 }
 0x241   :  { %v894_v38 = vpop.f32.mrf.mxu1 }
 0x242   :  { %789 = vst [vmem:[#allocation8 + $0x88] sm:$0xff] %v713_v37  ;;  %v895_v39 = vadd.f32 %v894_v38, %v893_v36 }
 0x243   :  { %v896_v40 = vpop.f32.mrf.mxu1 }
 0x244   :  { %v718_v41 = vadd.f32 %v895_v39, %v1153_v30 }
 0x245   :  { %v897_v42 = vpop.f32.mrf.mxu1 }
 0x246   :  { %790 = vst [vmem:[#allocation8 + $0x90] sm:$0xff] %v718_v41  ;;  %v898_v43 = vadd.f32 %v897_v42, %v896_v40 }
 0x247   :  { %v899_v44 = vpop.f32.mrf.mxu1 }
 0x248   :  { %v721_v45 = vadd.f32 %v898_v43, %v1153_v30 }
 0x249   :  { %v900_v46 = vpop.f32.mrf.mxu1 }
 0x24a   :  { %791 = vst [vmem:[#allocation8 + $0x98] sm:$0xff] %v721_v45  ;;  %v901_v47 = vadd.f32 %v900_v46, %v899_v44 }
 0x24b   :  { %v902_v48 = vpop.f32.mrf.mxu1 }
 0x24c   :  { %v726_v49 = vadd.f32 %v901_v47, %v1153_v30 }
 0x24d   :  { %v903_v50 = vpop.f32.mrf.mxu1 }
 0x24e   :  { %792 = vst [vmem:[#allocation8 + $0xa0] sm:$0xff] %v726_v49  ;;  %v904_v51 = vadd.f32 %v903_v50, %v902_v48 }
 0x24f   :  { %v905_v52 = vpop.f32.mrf.mxu1 }
 0x250   :  { %v729_v53 = vadd.f32 %v904_v51, %v1153_v30 }
 0x251   :  { %v906_v56 = vpop.f32.mrf.mxu1 }
 0x252   :  { %793 = vst [vmem:[#allocation8 + $0xa8] sm:$0xff] %v729_v53  ;;  %v907_v57 = vadd.f32 %v906_v56, %v905_v52 }
 0x253   :  { %v908_v58 = vpop.f32.mrf.mxu1 }
 0x254   :  { %v734_v59 = vadd.f32 %v907_v57, %v1153_v30 }
 0x255   :  { %v909_v60 = vpop.f32.mrf.mxu1 }
 0x256   :  { %794 = vst [vmem:[#allocation8 + $0xb0] sm:$0xff] %v734_v59  ;;  %v910_v61 = vadd.f32 %v909_v60, %v908_v58 }
 0x257   :  { %v911_v62 = vpop.f32.mrf.mxu1 }
 0x258   :  { %v737_v63 = vadd.f32 %v910_v61, %v1153_v30 }
 0x259   :  { %v912_v0 = vpop.f32.mrf.mxu1 }
 0x25a   :  { %795 = vst [vmem:[#allocation8 + $0xb8] sm:$0xff] %v737_v63  ;;  %v913_v1 = vadd.f32 %v912_v0, %v911_v62 }
 0x25b   :  { %v914_v2 = vpop.f32.mrf.mxu1 }
 0x25c   :  { %v742_v3 = vadd.f32 %v913_v1, %v1153_v30 }
 0x25d   :  { %v915_v4 = vpop.f32.mrf.mxu1 }
 0x25e   :  { %796 = vst [vmem:[#allocation8 + $0xc0] sm:$0xff] %v742_v3  ;;  %v916_v5 = vadd.f32 %v915_v4, %v914_v2 }
 0x25f   :  { %v917_v6 = vpop.f32.mrf.mxu1 }
 0x260   :  { %v745_v7 = vadd.f32 %v916_v5, %v1153_v30 }
 0x261   :  { %v918_v8 = vpop.f32.mrf.mxu1 }
 0x262   :  { %797 = vst [vmem:[#allocation8 + $0xc8] sm:$0xff] %v745_v7  ;;  %v919_v9 = vadd.f32 %v918_v8, %v917_v6 }
 0x263   :  { %v920_v10 = vpop.f32.mrf.mxu1 }
 0x264   :  { %v750_v11 = vadd.f32 %v919_v9, %v1153_v30 }
 0x265   :  { %v921_v12 = vpop.f32.mrf.mxu1 }
 0x266   :  { %798 = vst [vmem:[#allocation8 + $0xd0] sm:$0xff] %v750_v11  ;;  %v922_v13 = vadd.f32 %v921_v12, %v920_v10 }
 0x267   :  { %v923_v14 = vpop.f32.mrf.mxu1 }
 0x268   :  { %v753_v15 = vadd.f32 %v922_v13, %v1153_v30 }
 0x269   :  { %v924_v16 = vpop.f32.mrf.mxu1 }
 0x26a   :  { %799 = vst [vmem:[#allocation8 + $0xd8] sm:$0xff] %v753_v15  ;;  %v925_v17 = vadd.f32 %v924_v16, %v923_v14 }
 0x26b   :  { %v926_v18 = vpop.f32.mrf.mxu1 }
 0x26c   :  { %v758_v19 = vadd.f32 %v925_v17, %v1153_v30 }
 0x26d   :  { %v927_v20 = vpop.f32.mrf.mxu1 }
 0x26e   :  { %800 = vst [vmem:[#allocation8 + $0xe0] sm:$0xff] %v758_v19  ;;  %v928_v21 = vadd.f32 %v927_v20, %v926_v18 }
 0x26f   :  { %v929_v22 = vpop.f32.mrf.mxu1 }
 0x270   :  { %v761_v23 = vadd.f32 %v928_v21, %v1153_v30 }
 0x271   :  { %v930_v24 = vpop.f32.mrf.mxu1 }
 0x272   :  { %801 = vst [vmem:[#allocation8 + $0xe8] sm:$0xff] %v761_v23  ;;  %v931_v25 = vadd.f32 %v930_v24, %v929_v22 }
 0x273   :  { %v932_v26 = vpop.f32.mrf.mxu1 }
 0x274   :  { %v766_v27 = vadd.f32 %v931_v25, %v1153_v30 }
 0x275   :  { %v933_v28 = vpop.f32.mrf.mxu1 }
 0x276   :  { %802 = vst [vmem:[#allocation8 + $0xf0] sm:$0xff] %v766_v27  ;;  %v934_v29 = vadd.f32 %v933_v28, %v932_v26 }
 0x278   :  { %v769_v31 = vadd.f32 %v934_v29, %v1153_v30 }
 0x27a   :  { %803 = vst [vmem:[#allocation8 + $0xf8] sm:$0xff] %v769_v31 }
 0x27b   :  { %1014 = shalt.err (!%p1011_p5)
}
 0x27c   :  { %815 = dma.vmem_to_hbm [thread:$0]  %s810_s12, 4096, %s1198_s5, [#allocation4], %s1034_s1, %s1034_s1, %s1035_s8  }
 0x27d   :  { %1027 = dma.done.wait [#allocation4], 4096  }
 0x27e   :  { %1028 = vsyncadd [#allocation4], 4294963200 }
 0x27f   :  { %819 = vsyncpa [#allocation3], 1 }
 0x280   :  { %820 = vsyncpa [#allocation6], 1 }
 0x281   :  { %821 = vsyncpa [#allocation4], 1 }

</bundles_post_ra>
